<compile_context>
chip_gen: v7x
topology: tpu7x:2x2x1
jax: 0.10.0
libtpu: 0.0.40
codegen_flags: <defaults>
</compile_context>

<pallas_src>
import functools
import math

import jax
import jax.numpy as jnp
from jax.experimental import pallas as pl
from jax.experimental.pallas import tpu as pltpu


def _round_up(x, m):
    return (x + m - 1) // m * m


def _resident_spec(block_shape, index_map):
    """Constant-index (resident) operand: single-buffer it (perf feedback)."""
    if hasattr(pl, "Buffered"):
        try:
            return pl.BlockSpec(block_shape, index_map, pipeline_mode=pl.Buffered(1))
        except TypeError:
            pass
    return pl.BlockSpec(block_shape, index_map)


# ----------------------------------------------------------------------------
# Fused kernel: per grid step it processes a (batch block, Sq tile) with ALL heads:
#   logits -> softmax -> probs@v -> (head merge + W_out projection) -> lane-dense store.
# ----------------------------------------------------------------------------
def _fused_attn_kernel(*refs, n_heads, scale, has_proj, return_stats):
    # Ref order: q, k, v, [wt, b], o, [logits, probs]
    q_ref, k_ref, v_ref = refs[0], refs[1], refs[2]
    pos = 3
    if has_proj:
        wt_ref, b_ref = refs[pos], refs[pos + 1]
        pos += 2
    o_ref = refs[pos]
    if return_stats:
        logits_ref, probs_ref = refs[pos + 1], refs[pos + 2]

    q = q_ref[...]            # (bn, tq, E)  native dtype -> bf16 MXU path when bf16
    k = k_ref[...]            # (bn, Skv, E)
    v = v_ref[...]            # (bn, Skv, E)
    bn, tq, e_dim = q.shape
    dh = e_dim // n_heads

    y = None                  # f32 accumulator: (bn*tq, E) if has_proj else (bn, tq, E)
    logits_parts = []
    probs_parts = []
    for h in range(n_heads):  # static unroll; all per-head work stays in VMEM/vregs
        lo, hi = h * dh, (h + 1) * dh
        q_h = q[:, :, lo:hi]
        k_h = k[:, :, lo:hi]
        v_h = v[:, :, lo:hi]

        # attention_logits = q_h @ k_h^T / sqrt(d_head)  (batched matmul, f32 accum)
        logits_h = jnp.einsum(
            "bqd,bkd->bqk", q_h, k_h, preferred_element_type=jnp.float32
        ) * scale

        # softmax over keys; reciprocal runs on the EUP instead of a VPU divide
        m_h = jnp.max(logits_h, axis=-1, keepdims=True)
        e_h = jnp.exp(logits_h - m_h)
        s_h = jnp.sum(e_h, axis=-1, keepdims=True)
        probs_h = e_h * pl.reciprocal(s_h, approx=False)

        # TODO(synk): training-mode attention dropout (needs in-kernel RNG); eval path only.

        if return_stats:
            logits_parts.append(logits_h)
            probs_parts.append(probs_h)

        # context = probs @ v
        ctx_h = jnp.einsum(
            "bqk,bkd->bqd", probs_h.astype(v.dtype), v_h,
            preferred_element_type=jnp.float32,
        )

        if has_proj:
            # Fused head-merge + W_out: accumulate ctx_h @ Wt[h*dh:(h+1)*dh, :]
            w_h = wt_ref[lo:hi, :]                                  # (dh, E) resident slab
            part = jnp.dot(
                ctx_h.reshape(bn * tq, dh).astype(w_h.dtype), w_h,
                preferred_element_type=jnp.float32,
            )
            y = part if y is None else y + part
        else:
            y = ctx_h if y is None else jnp.concatenate([y, ctx_h], axis=-1)

    if has_proj:
        y = y + b_ref[...].astype(jnp.float32)                      # (bn*tq, E) + (1, E)
        y = y.reshape(bn, tq, e_dim)
    o_ref[...] = y.astype(o_ref.dtype)                              # lane-dense (E-wide) store

    if return_stats:
        logits_ref[...] = jnp.stack(logits_parts, axis=1).astype(logits_ref.dtype)
        probs_ref[...] = jnp.stack(probs_parts, axis=1).astype(probs_ref.dtype)


# ----------------------------------------------------------------------------
# Module-level forward: matches _QKVMatrixMultiplication.forward semantics.
# ----------------------------------------------------------------------------
def qkv_matrix_multiplication(q, k, v, params, *, n_heads, dropout=0.0, return_stats=True):
    """q: (N, S_q, E), k/v: (N, S_kv, E).  Returns (x, stats)."""
    del dropout  # TODO(synk): dropout>0 (training) needs in-kernel RNG; eval path only.
    N, Sq, E = q.shape
    Skv = k.shape[1]
    if k.shape[-1] != E or v.shape[-1] != E:
        raise ValueError("q, k, v must share the token dimension")
    if E % n_heads != 0:
        raise ValueError("d_token must be a multiple of n_heads")
    has_proj = n_heads > 1
    if has_proj and ("w_out" not in params or "b_out" not in params):
        raise ValueError("n_heads > 1 requires w_out / b_out parameters")

    d_head_key = k.shape[-1] // n_heads
    scale = 1.0 / math.sqrt(d_head_key)
    itemsize = jnp.dtype(q.dtype).itemsize

    # ---- tile / VMEM-budget selection --------------------------------------
    budget = 24 * 2 ** 20

    def step_bytes(bn, tq_):
        io = bn * (tq_ * E + 2 * Skv * E + tq_ * E) * itemsize      # q + k + v + x blocks
        stats = (2 * bn * n_heads * tq_ * Skv * 4) if return_stats else 0
        resident = (E * E + E) * 4 if has_proj else 0
        return 2 * (io + stats) + resident                          # 2x: double buffering

    tq = min(512, _round_up(Sq, 8))
    while tq > 8 and step_bytes(1, tq) > budget:
        tq = max(8, tq // 2)
    sq_pad = _round_up(Sq, tq)

    bn = 1
    for d in range(N, 0, -1):
        if N % d == 0 and step_bytes(d, tq) <= budget:
            bn = d
            break
    # Keep the parallel grid >= 2 steps when possible (v7x has 2 TensorCores).
    if (N // bn) * (sq_pad // tq) < 2 and bn > 1:
        bn = max(d for d in range(1, bn) if N % d == 0)
    grid = (N // bn, sq_pad // tq)
    vmem_limit = int(min(max(32 * 2 ** 20, 2 * step_bytes(bn, tq)), 96 * 2 ** 20))

    q_p = q if sq_pad == Sq else jnp.pad(q, ((0, 0), (0, sq_pad - Sq), (0, 0)))

    # ---- specs --------------------------------------------------------------
    in_specs = [
        pl.BlockSpec((bn, tq, E), lambda b, s: (b, s, 0)),
        pl.BlockSpec((bn, Skv, E), lambda b, s: (b, 0, 0)),   # constant over Sq axis ->
        pl.BlockSpec((bn, Skv, E), lambda b, s: (b, 0, 0)),   #   K/V DMA'd once per batch block
    ]
    args = [q_p, k, v]
    if has_proj:
        wt = jnp.transpose(params["w_out"])                   # (E_in, E_out), transposed ONCE
        b2d = params["b_out"].reshape(1, E)
        in_specs += [
            _resident_spec((E, E), lambda b, s: (0, 0)),      # resident, single-buffered
            _resident_spec((1, E), lambda b, s: (0, 0)),
        ]
        args += [wt, b2d]

    out_shapes = [jax.ShapeDtypeStruct((N, sq_pad, E), q.dtype)]
    out_specs = [pl.BlockSpec((bn, tq, E), lambda b, s: (b, s, 0))]
    if return_stats:
        out_shapes += [jax.ShapeDtypeStruct((N, n_heads, sq_pad, Skv), jnp.float32)] * 2
        out_specs += [pl.BlockSpec((bn, n_heads, tq, Skv), lambda b, s: (b, 0, s, 0))] * 2

    flops = 4 * N * sq_pad * Skv * E + (2 * N * sq_pad * E * E if has_proj else 0)
    bytes_accessed = itemsize * N * (2 * sq_pad * E + 2 * Skv * E)
    if return_stats:
        bytes_accessed += 8 * N * n_heads * sq_pad * Skv
    if has_proj:
        bytes_accessed += 4 * (E * E + E)

    kernel = functools.partial(
        _fused_attn_kernel, n_heads=n_heads, scale=scale,
        has_proj=has_proj, return_stats=return_stats,
    )
    results = pl.pallas_call(
        kernel,
        out_shape=tuple(out_shapes),
        grid_spec=pltpu.PrefetchScalarGridSpec(
            num_scalar_prefetch=0,
            grid=grid,
            in_specs=in_specs,
            out_specs=tuple(out_specs),
        ),
        compiler_params=pltpu.CompilerParams(
            dimension_semantics=("parallel", "parallel"),
            vmem_limit_bytes=vmem_limit,
        ),
        cost_estimate=pl.CostEstimate(
            flops=flops,
            transcendentals=N * n_heads * sq_pad * Skv,
            bytes_accessed=bytes_accessed,
        ),
    )(*args)

    x = results[0][:, :Sq]
    stats = {}
    if return_stats:
        logits4, probs4 = results[1], results[2]
        stats = {
            "attention_logits": logits4[:, :, :Sq, :].reshape(N * n_heads, Sq, Skv),
            "attention_probs": probs4[:, :, :Sq, :].reshape(N * n_heads, Sq, Skv),
        }
    return x, stats


def init_params(key, d_token, n_heads):
    """W_out exists only when n_heads > 1; bias is zero-initialized (as in the module)."""
    if n_heads <= 1:
        return {}
    bound = 1.0 / math.sqrt(d_token)  # nn.Linear default kaiming_uniform_(a=sqrt(5)) bound
    w = jax.random.uniform(
        key, (d_token, d_token), minval=-bound, maxval=bound, dtype=jnp.float32
    )
    return {"w_out": w, "b_out": jnp.zeros((d_token,), dtype=jnp.float32)}


# ----------------------------------------------------------------------------
# Pure-JAX reference (mirrors the PyTorch module exactly).
# ----------------------------------------------------------------------------
def _ref_forward(q, k, v, params, n_heads):
    N, Sq, E = q.shape
    dh = E // n_heads

    def split(x):
        b, s, d = x.shape
        return (x.reshape(b, s, n_heads, d // n_heads)
                 .transpose(0, 2, 1, 3)
                 .reshape(b * n_heads, s, d // n_heads))

    qh, kh, vh = split(q), split(k), split(v)
    logits = jnp.einsum("bqd,bkd->bqk", qh, kh) / math.sqrt(dh)
    probs = jax.nn.softmax(logits, axis=-1)
    x = jnp.einsum("bqk,bkd->bqd", probs, vh)
    x = x.reshape(N, n_heads, Sq, dh).transpose(0, 2, 1, 3).reshape(N, Sq, E)
    if n_heads > 1:
        x = x @ params["w_out"].T + params["b_out"]
    return x, logits, probs


if __name__ == "__main__":
    d_token, n_heads = 32, 4
    N, S_q, S_kv = 2, 8, 8

    key = jax.random.PRNGKey(0)
    k_params, k_q, k_k, k_v = jax.random.split(key, 4)

    params = init_params(k_params, d_token, n_heads)
    q = jax.random.normal(k_q, (N, S_q, d_token), dtype=jnp.float32)
    k = jax.random.normal(k_k, (N, S_kv, d_token), dtype=jnp.float32)
    v = jax.random.normal(k_v, (N, S_kv, d_token), dtype=jnp.float32)

    # Multi-head (fused W_out projection), stats returned (module semantics).
    x, stats = qkv_matrix_multiplication(q, k, v, params, n_heads=n_heads, dropout=0.0)
    jax.block_until_ready((x, stats))

    x_ref, logits_ref, probs_ref = _ref_forward(q, k, v, params, n_heads)
    assert x.shape == (N, S_q, d_token)
    assert stats["attention_logits"].shape == (N * n_heads, S_q, S_kv)
    assert stats["attention_probs"].shape == (N * n_heads, S_q, S_kv)
    assert jnp.allclose(stats["attention_logits"], logits_ref, atol=1e-4)
    assert jnp.allclose(stats["attention_probs"], probs_ref, atol=1e-5)
    assert jnp.allclose(x, x_ref, atol=1e-4)

    # Stats-free fast path (no quadratic HBM writeback) must match.
    x_fast, empty = qkv_matrix_multiplication(
        q, k, v, params, n_heads=n_heads, return_stats=False
    )
    jax.block_until_ready(x_fast)
    assert empty == {}
    assert jnp.allclose(x_fast, x, atol=1e-5)

    # Single-head path (module has no W_out in that case).
    x1, stats1 = qkv_matrix_multiplication(q, k, v, {}, n_heads=1)
    jax.block_until_ready((x1, stats1))
    x1_ref, logits1_ref, probs1_ref = _ref_forward(q, k, v, {}, 1)
    assert jnp.allclose(x1, x1_ref, atol=1e-4)
    assert jnp.allclose(stats1["attention_logits"], logits1_ref, atol=1e-4)
    assert jnp.allclose(stats1["attention_probs"], probs1_ref, atol=1e-5)

    print("KERNEL_OK")
</pallas_src>

<mosaic_0001>
module attributes {stable_mosaic.version = 11 : i64} {
  func.func @_fused_attn_kernel(%arg0: i32, %arg1: i32, %arg2: memref<1x8x32xf32, #tpu.memory_space<vmem>>, %arg3: memref<1x8x32xf32, #tpu.memory_space<vmem>>, %arg4: memref<1x8x32xf32, #tpu.memory_space<vmem>>, %arg5: memref<32x32xf32, #tpu.memory_space<vmem>>, %arg6: memref<1x32xf32, #tpu.memory_space<vmem>>, %arg7: memref<1x8x32xf32, #tpu.memory_space<vmem>>, %arg8: memref<1x4x8x8xf32, #tpu.memory_space<vmem>>, %arg9: memref<1x4x8x8xf32, #tpu.memory_space<vmem>>) attributes {dimension_semantics = [#tpu.dimension_semantics<parallel>, #tpu.dimension_semantics<parallel>], iteration_bounds = array<i64: 2, 1>, scalar_prefetch = 0 : i64, scratch_operands = 0 : i64, tpu.core_type = #tpu.core_type<tc>, window_params = [{transform_indices = @transform_0, window_bounds = array<i64: 1, 8, 32>}, {transform_indices = @transform_1, window_bounds = array<i64: 1, 8, 32>}, {transform_indices = @transform_2, window_bounds = array<i64: 1, 8, 32>}, {pipeline_mode = #tpu.pipeline_mode<synchronous>, transform_indices = @transform_3, window_bounds = array<i64: 32, 32>}, {pipeline_mode = #tpu.pipeline_mode<synchronous>, transform_indices = @transform_4, window_bounds = array<i64: 1, 32>}, {transform_indices = @transform_5, window_bounds = array<i64: 1, 8, 32>}, {transform_indices = @transform_6, window_bounds = array<i64: 1, 4, 8, 8>}, {transform_indices = @transform_7, window_bounds = array<i64: 1, 4, 8, 8>}]} {
    %c0 = arith.constant 0 : index
    %c0_0 = arith.constant 0 : index
    %c0_1 = arith.constant 0 : index
    %0 = vector.load %arg2[%c0, %c0_0, %c0_1] : memref<1x8x32xf32, #tpu.memory_space<vmem>>, vector<1x8x32xf32>
    %c0_2 = arith.constant 0 : index
    %c0_3 = arith.constant 0 : index
    %c0_4 = arith.constant 0 : index
    %1 = vector.load %arg3[%c0_2, %c0_3, %c0_4] : memref<1x8x32xf32, #tpu.memory_space<vmem>>, vector<1x8x32xf32>
    %c0_5 = arith.constant 0 : index
    %c0_6 = arith.constant 0 : index
    %c0_7 = arith.constant 0 : index
    %2 = vector.load %arg4[%c0_5, %c0_6, %c0_7] : memref<1x8x32xf32, #tpu.memory_space<vmem>>, vector<1x8x32xf32>
    %3 = vector.extract_strided_slice %0 {offsets = [0, 0, 0], sizes = [1, 8, 8], strides = [1, 1, 1]} : vector<1x8x32xf32> to vector<1x8x8xf32>
    %4 = vector.extract_strided_slice %1 {offsets = [0, 0, 0], sizes = [1, 8, 8], strides = [1, 1, 1]} : vector<1x8x32xf32> to vector<1x8x8xf32>
    %5 = vector.extract_strided_slice %2 {offsets = [0, 0, 0], sizes = [1, 8, 8], strides = [1, 1, 1]} : vector<1x8x32xf32> to vector<1x8x8xf32>
    "tpu.trace_start"() <{level = 10 : i32, message = "bqd,bkd->bqk"}> : () -> ()
    %cst = arith.constant dense<0.000000e+00> : vector<1x8x8xf32>
    %6 = tpu.matmul %3, %4, %cst {dimension_numbers = #tpu.dot_dimension_numbers<[2], [2], [1], [1], [0, 0, 0, 1, 1, 1], [0], [0]>} : vector<1x8x8xf32>, vector<1x8x8xf32>, vector<1x8x8xf32> -> vector<1x8x8xf32>
    "tpu.trace_stop"() : () -> ()
    %cst_8 = arith.constant 0.353553385 : f32
    %7 = vector.broadcast %cst_8 : f32 to vector<1x8x8xf32>
    %8 = arith.mulf %6, %7 : vector<1x8x8xf32>
    %cst_9 = arith.constant dense<0xFF800000> : vector<1x8xf32>
    %9 = vector.multi_reduction <maximumf>, %8, %cst_9 [2] : vector<1x8x8xf32> to vector<1x8xf32>
    %10 = vector.shape_cast %9 : vector<1x8xf32> to vector<1x8x1xf32>
    %11 = vector.broadcast %10 : vector<1x8x1xf32> to vector<1x8x8xf32>
    %12 = arith.subf %8, %11 : vector<1x8x8xf32>
    %13 = math.exp %12 : vector<1x8x8xf32>
    %cst_10 = arith.constant dense<0.000000e+00> : vector<1x8xf32>
    %14 = vector.multi_reduction <add>, %13, %cst_10 [2] : vector<1x8x8xf32> to vector<1x8xf32>
    %15 = vector.shape_cast %14 : vector<1x8xf32> to vector<1x8x1xf32>
    %16 = tpu.reciprocal %15 : vector<1x8x1xf32> -> vector<1x8x1xf32>
    %17 = vector.broadcast %16 : vector<1x8x1xf32> to vector<1x8x8xf32>
    %18 = arith.mulf %13, %17 : vector<1x8x8xf32>
    "tpu.trace_start"() <{level = 10 : i32, message = "bqk,bkd->bqd"}> : () -> ()
    %cst_11 = arith.constant dense<0.000000e+00> : vector<1x8x8xf32>
    %19 = tpu.matmul %18, %5, %cst_11 {dimension_numbers = #tpu.dot_dimension_numbers<[2], [1], [1], [2], [0, 0, 0, 1, 1, 2], [0], [0]>} : vector<1x8x8xf32>, vector<1x8x8xf32>, vector<1x8x8xf32> -> vector<1x8x8xf32>
    "tpu.trace_stop"() : () -> ()
    %c0_12 = arith.constant 0 : index
    %c0_13 = arith.constant 0 : index
    %20 = vector.load %arg5[%c0_12, %c0_13] : memref<32x32xf32, #tpu.memory_space<vmem>>, vector<8x32xf32>
    %21 = vector.shape_cast %19 : vector<1x8x8xf32> to vector<8x8xf32>
    %cst_14 = arith.constant dense<0.000000e+00> : vector<8x32xf32>
    %22 = tpu.matmul %21, %20, %cst_14 {dimension_numbers = #tpu.dot_dimension_numbers<[1], [0], [0], [1], [0, 0, 1, 1], [], []>} : vector<8x8xf32>, vector<8x32xf32>, vector<8x32xf32> -> vector<8x32xf32>
    %23 = vector.extract_strided_slice %0 {offsets = [0, 0, 8], sizes = [1, 8, 8], strides = [1, 1, 1]} : vector<1x8x32xf32> to vector<1x8x8xf32>
    %24 = vector.extract_strided_slice %1 {offsets = [0, 0, 8], sizes = [1, 8, 8], strides = [1, 1, 1]} : vector<1x8x32xf32> to vector<1x8x8xf32>
    %25 = vector.extract_strided_slice %2 {offsets = [0, 0, 8], sizes = [1, 8, 8], strides = [1, 1, 1]} : vector<1x8x32xf32> to vector<1x8x8xf32>
    "tpu.trace_start"() <{level = 10 : i32, message = "bqd,bkd->bqk"}> : () -> ()
    %cst_15 = arith.constant dense<0.000000e+00> : vector<1x8x8xf32>
    %26 = tpu.matmul %23, %24, %cst_15 {dimension_numbers = #tpu.dot_dimension_numbers<[2], [2], [1], [1], [0, 0, 0, 1, 1, 1], [0], [0]>} : vector<1x8x8xf32>, vector<1x8x8xf32>, vector<1x8x8xf32> -> vector<1x8x8xf32>
    "tpu.trace_stop"() : () -> ()
    %cst_16 = arith.constant 0.353553385 : f32
    %27 = vector.broadcast %cst_16 : f32 to vector<1x8x8xf32>
    %28 = arith.mulf %26, %27 : vector<1x8x8xf32>
    %cst_17 = arith.constant dense<0xFF800000> : vector<1x8xf32>
    %29 = vector.multi_reduction <maximumf>, %28, %cst_17 [2] : vector<1x8x8xf32> to vector<1x8xf32>
    %30 = vector.shape_cast %29 : vector<1x8xf32> to vector<1x8x1xf32>
    %31 = vector.broadcast %30 : vector<1x8x1xf32> to vector<1x8x8xf32>
    %32 = arith.subf %28, %31 : vector<1x8x8xf32>
    %33 = math.exp %32 : vector<1x8x8xf32>
    %cst_18 = arith.constant dense<0.000000e+00> : vector<1x8xf32>
    %34 = vector.multi_reduction <add>, %33, %cst_18 [2] : vector<1x8x8xf32> to vector<1x8xf32>
    %35 = vector.shape_cast %34 : vector<1x8xf32> to vector<1x8x1xf32>
    %36 = tpu.reciprocal %35 : vector<1x8x1xf32> -> vector<1x8x1xf32>
    %37 = vector.broadcast %36 : vector<1x8x1xf32> to vector<1x8x8xf32>
    %38 = arith.mulf %33, %37 : vector<1x8x8xf32>
    "tpu.trace_start"() <{level = 10 : i32, message = "bqk,bkd->bqd"}> : () -> ()
    %cst_19 = arith.constant dense<0.000000e+00> : vector<1x8x8xf32>
    %39 = tpu.matmul %38, %25, %cst_19 {dimension_numbers = #tpu.dot_dimension_numbers<[2], [1], [1], [2], [0, 0, 0, 1, 1, 2], [0], [0]>} : vector<1x8x8xf32>, vector<1x8x8xf32>, vector<1x8x8xf32> -> vector<1x8x8xf32>
    "tpu.trace_stop"() : () -> ()
    %c8 = arith.constant 8 : index
    %c0_20 = arith.constant 0 : index
    %40 = vector.load %arg5[%c8, %c0_20] : memref<32x32xf32, #tpu.memory_space<vmem>>, vector<8x32xf32>
    %41 = vector.shape_cast %39 : vector<1x8x8xf32> to vector<8x8xf32>
    %cst_21 = arith.constant dense<0.000000e+00> : vector<8x32xf32>
    %42 = tpu.matmul %41, %40, %cst_21 {dimension_numbers = #tpu.dot_dimension_numbers<[1], [0], [0], [1], [0, 0, 1, 1], [], []>} : vector<8x8xf32>, vector<8x32xf32>, vector<8x32xf32> -> vector<8x32xf32>
    %43 = arith.addf %22, %42 : vector<8x32xf32>
    %44 = vector.extract_strided_slice %0 {offsets = [0, 0, 16], sizes = [1, 8, 8], strides = [1, 1, 1]} : vector<1x8x32xf32> to vector<1x8x8xf32>
    %45 = vector.extract_strided_slice %1 {offsets = [0, 0, 16], sizes = [1, 8, 8], strides = [1, 1, 1]} : vector<1x8x32xf32> to vector<1x8x8xf32>
    %46 = vector.extract_strided_slice %2 {offsets = [0, 0, 16], sizes = [1, 8, 8], strides = [1, 1, 1]} : vector<1x8x32xf32> to vector<1x8x8xf32>
    "tpu.trace_start"() <{level = 10 : i32, message = "bqd,bkd->bqk"}> : () -> ()
    %cst_22 = arith.constant dense<0.000000e+00> : vector<1x8x8xf32>
    %47 = tpu.matmul %44, %45, %cst_22 {dimension_numbers = #tpu.dot_dimension_numbers<[2], [2], [1], [1], [0, 0, 0, 1, 1, 1], [0], [0]>} : vector<1x8x8xf32>, vector<1x8x8xf32>, vector<1x8x8xf32> -> vector<1x8x8xf32>
    "tpu.trace_stop"() : () -> ()
    %cst_23 = arith.constant 0.353553385 : f32
    %48 = vector.broadcast %cst_23 : f32 to vector<1x8x8xf32>
    %49 = arith.mulf %47, %48 : vector<1x8x8xf32>
    %cst_24 = arith.constant dense<0xFF800000> : vector<1x8xf32>
    %50 = vector.multi_reduction <maximumf>, %49, %cst_24 [2] : vector<1x8x8xf32> to vector<1x8xf32>
    %51 = vector.shape_cast %50 : vector<1x8xf32> to vector<1x8x1xf32>
    %52 = vector.broadcast %51 : vector<1x8x1xf32> to vector<1x8x8xf32>
    %53 = arith.subf %49, %52 : vector<1x8x8xf32>
    %54 = math.exp %53 : vector<1x8x8xf32>
    %cst_25 = arith.constant dense<0.000000e+00> : vector<1x8xf32>
    %55 = vector.multi_reduction <add>, %54, %cst_25 [2] : vector<1x8x8xf32> to vector<1x8xf32>
    %56 = vector.shape_cast %55 : vector<1x8xf32> to vector<1x8x1xf32>
    %57 = tpu.reciprocal %56 : vector<1x8x1xf32> -> vector<1x8x1xf32>
    %58 = vector.broadcast %57 : vector<1x8x1xf32> to vector<1x8x8xf32>
    %59 = arith.mulf %54, %58 : vector<1x8x8xf32>
    "tpu.trace_start"() <{level = 10 : i32, message = "bqk,bkd->bqd"}> : () -> ()
    %cst_26 = arith.constant dense<0.000000e+00> : vector<1x8x8xf32>
    %60 = tpu.matmul %59, %46, %cst_26 {dimension_numbers = #tpu.dot_dimension_numbers<[2], [1], [1], [2], [0, 0, 0, 1, 1, 2], [0], [0]>} : vector<1x8x8xf32>, vector<1x8x8xf32>, vector<1x8x8xf32> -> vector<1x8x8xf32>
    "tpu.trace_stop"() : () -> ()
    %c16 = arith.constant 16 : index
    %c0_27 = arith.constant 0 : index
    %61 = vector.load %arg5[%c16, %c0_27] : memref<32x32xf32, #tpu.memory_space<vmem>>, vector<8x32xf32>
    %62 = vector.shape_cast %60 : vector<1x8x8xf32> to vector<8x8xf32>
    %cst_28 = arith.constant dense<0.000000e+00> : vector<8x32xf32>
    %63 = tpu.matmul %62, %61, %cst_28 {dimension_numbers = #tpu.dot_dimension_numbers<[1], [0], [0], [1], [0, 0, 1, 1], [], []>} : vector<8x8xf32>, vector<8x32xf32>, vector<8x32xf32> -> vector<8x32xf32>
    %64 = arith.addf %43, %63 : vector<8x32xf32>
    %65 = vector.extract_strided_slice %0 {offsets = [0, 0, 24], sizes = [1, 8, 8], strides = [1, 1, 1]} : vector<1x8x32xf32> to vector<1x8x8xf32>
    %66 = vector.extract_strided_slice %1 {offsets = [0, 0, 24], sizes = [1, 8, 8], strides = [1, 1, 1]} : vector<1x8x32xf32> to vector<1x8x8xf32>
    %67 = vector.extract_strided_slice %2 {offsets = [0, 0, 24], sizes = [1, 8, 8], strides = [1, 1, 1]} : vector<1x8x32xf32> to vector<1x8x8xf32>
    "tpu.trace_start"() <{level = 10 : i32, message = "bqd,bkd->bqk"}> : () -> ()
    %cst_29 = arith.constant dense<0.000000e+00> : vector<1x8x8xf32>
    %68 = tpu.matmul %65, %66, %cst_29 {dimension_numbers = #tpu.dot_dimension_numbers<[2], [2], [1], [1], [0, 0, 0, 1, 1, 1], [0], [0]>} : vector<1x8x8xf32>, vector<1x8x8xf32>, vector<1x8x8xf32> -> vector<1x8x8xf32>
    "tpu.trace_stop"() : () -> ()
    %cst_30 = arith.constant 0.353553385 : f32
    %69 = vector.broadcast %cst_30 : f32 to vector<1x8x8xf32>
    %70 = arith.mulf %68, %69 : vector<1x8x8xf32>
    %cst_31 = arith.constant dense<0xFF800000> : vector<1x8xf32>
    %71 = vector.multi_reduction <maximumf>, %70, %cst_31 [2] : vector<1x8x8xf32> to vector<1x8xf32>
    %72 = vector.shape_cast %71 : vector<1x8xf32> to vector<1x8x1xf32>
    %73 = vector.broadcast %72 : vector<1x8x1xf32> to vector<1x8x8xf32>
    %74 = arith.subf %70, %73 : vector<1x8x8xf32>
    %75 = math.exp %74 : vector<1x8x8xf32>
    %cst_32 = arith.constant dense<0.000000e+00> : vector<1x8xf32>
    %76 = vector.multi_reduction <add>, %75, %cst_32 [2] : vector<1x8x8xf32> to vector<1x8xf32>
    %77 = vector.shape_cast %76 : vector<1x8xf32> to vector<1x8x1xf32>
    %78 = tpu.reciprocal %77 : vector<1x8x1xf32> -> vector<1x8x1xf32>
    %79 = vector.broadcast %78 : vector<1x8x1xf32> to vector<1x8x8xf32>
    %80 = arith.mulf %75, %79 : vector<1x8x8xf32>
    "tpu.trace_start"() <{level = 10 : i32, message = "bqk,bkd->bqd"}> : () -> ()
    %cst_33 = arith.constant dense<0.000000e+00> : vector<1x8x8xf32>
    %81 = tpu.matmul %80, %67, %cst_33 {dimension_numbers = #tpu.dot_dimension_numbers<[2], [1], [1], [2], [0, 0, 0, 1, 1, 2], [0], [0]>} : vector<1x8x8xf32>, vector<1x8x8xf32>, vector<1x8x8xf32> -> vector<1x8x8xf32>
    "tpu.trace_stop"() : () -> ()
    %c24 = arith.constant 24 : index
    %c0_34 = arith.constant 0 : index
    %82 = vector.load %arg5[%c24, %c0_34] : memref<32x32xf32, #tpu.memory_space<vmem>>, vector<8x32xf32>
    %83 = vector.shape_cast %81 : vector<1x8x8xf32> to vector<8x8xf32>
    %cst_35 = arith.constant dense<0.000000e+00> : vector<8x32xf32>
    %84 = tpu.matmul %83, %82, %cst_35 {dimension_numbers = #tpu.dot_dimension_numbers<[1], [0], [0], [1], [0, 0, 1, 1], [], []>} : vector<8x8xf32>, vector<8x32xf32>, vector<8x32xf32> -> vector<8x32xf32>
    %85 = arith.addf %64, %84 : vector<8x32xf32>
    %c0_36 = arith.constant 0 : index
    %c0_37 = arith.constant 0 : index
    %86 = vector.load %arg6[%c0_36, %c0_37] : memref<1x32xf32, #tpu.memory_space<vmem>>, vector<1x32xf32>
    %87 = vector.broadcast %86 : vector<1x32xf32> to vector<8x32xf32>
    %88 = arith.addf %85, %87 : vector<8x32xf32>
    %89 = vector.shape_cast %88 : vector<8x32xf32> to vector<1x8x32xf32>
    %c0_38 = arith.constant 0 : index
    %c0_39 = arith.constant 0 : index
    %c0_40 = arith.constant 0 : index
    %90 = vector.load %arg7[%c0_38, %c0_39, %c0_40] : memref<1x8x32xf32, #tpu.memory_space<vmem>>, vector<1x8x32xf32>
    tpu.vector_store %arg7[%c0_38, %c0_39, %c0_40], %89 {strides = array<i32>} : memref<1x8x32xf32, #tpu.memory_space<vmem>>, vector<1x8x32xf32>,
    %91 = vector.shape_cast %8 : vector<1x8x8xf32> to vector<1x1x8x8xf32>
    %92 = vector.shape_cast %28 : vector<1x8x8xf32> to vector<1x1x8x8xf32>
    %93 = vector.shape_cast %49 : vector<1x8x8xf32> to vector<1x1x8x8xf32>
    %94 = vector.shape_cast %70 : vector<1x8x8xf32> to vector<1x1x8x8xf32>
    %95 = tpu.concatenate %91, %92, %93, %94 in 1 : vector<1x1x8x8xf32>, vector<1x1x8x8xf32>, vector<1x1x8x8xf32>, vector<1x1x8x8xf32> -> vector<1x4x8x8xf32>
    %c0_41 = arith.constant 0 : index
    %c0_42 = arith.constant 0 : index
    %c0_43 = arith.constant 0 : index
    %c0_44 = arith.constant 0 : index
    %96 = vector.load %arg8[%c0_41, %c0_42, %c0_43, %c0_44] : memref<1x4x8x8xf32, #tpu.memory_space<vmem>>, vector<1x4x8x8xf32>
    tpu.vector_store %arg8[%c0_41, %c0_42, %c0_43, %c0_44], %95 {strides = array<i32>} : memref<1x4x8x8xf32, #tpu.memory_space<vmem>>, vector<1x4x8x8xf32>,
    %97 = vector.shape_cast %18 : vector<1x8x8xf32> to vector<1x1x8x8xf32>
    %98 = vector.shape_cast %38 : vector<1x8x8xf32> to vector<1x1x8x8xf32>
    %99 = vector.shape_cast %59 : vector<1x8x8xf32> to vector<1x1x8x8xf32>
    %100 = vector.shape_cast %80 : vector<1x8x8xf32> to vector<1x1x8x8xf32>
    %101 = tpu.concatenate %97, %98, %99, %100 in 1 : vector<1x1x8x8xf32>, vector<1x1x8x8xf32>, vector<1x1x8x8xf32>, vector<1x1x8x8xf32> -> vector<1x4x8x8xf32>
    %c0_45 = arith.constant 0 : index
    %c0_46 = arith.constant 0 : index
    %c0_47 = arith.constant 0 : index
    %c0_48 = arith.constant 0 : index
    %102 = vector.load %arg9[%c0_45, %c0_46, %c0_47, %c0_48] : memref<1x4x8x8xf32, #tpu.memory_space<vmem>>, vector<1x4x8x8xf32>
    tpu.vector_store %arg9[%c0_45, %c0_46, %c0_47, %c0_48], %101 {strides = array<i32>} : memref<1x4x8x8xf32, #tpu.memory_space<vmem>>, vector<1x4x8x8xf32>,
    return
  }
  func.func @transform_0(%arg0: i32, %arg1: i32) -> (i32, i32, i32) {
    %c0_i32 = arith.constant 0 : i32
    %c0_i32_0 = arith.constant 0 : i32
    return %arg0, %arg1, %c0_i32 : i32, i32, i32
  }
  func.func @transform_1(%arg0: i32, %arg1: i32) -> (i32, i32, i32) {
    %c0_i32 = arith.constant 0 : i32
    %c0_i32_0 = arith.constant 0 : i32
    %c0_i32_1 = arith.constant 0 : i32
    return %arg0, %c0_i32, %c0_i32_0 : i32, i32, i32
  }
  func.func @transform_2(%arg0: i32, %arg1: i32) -> (i32, i32, i32) {
    %c0_i32 = arith.constant 0 : i32
    %c0_i32_0 = arith.constant 0 : i32
    %c0_i32_1 = arith.constant 0 : i32
    return %arg0, %c0_i32, %c0_i32_0 : i32, i32, i32
  }
  func.func @transform_3(%arg0: i32, %arg1: i32) -> (i32, i32) {
    %c0_i32 = arith.constant 0 : i32
    %c0_i32_0 = arith.constant 0 : i32
    %c0_i32_1 = arith.constant 0 : i32
    return %c0_i32, %c0_i32_0 : i32, i32
  }
  func.func @transform_4(%arg0: i32, %arg1: i32) -> (i32, i32) {
    %c0_i32 = arith.constant 0 : i32
    %c0_i32_0 = arith.constant 0 : i32
    %c0_i32_1 = arith.constant 0 : i32
    return %c0_i32, %c0_i32_0 : i32, i32
  }
  func.func @transform_5(%arg0: i32, %arg1: i32) -> (i32, i32, i32) {
    %c0_i32 = arith.constant 0 : i32
    %c0_i32_0 = arith.constant 0 : i32
    return %arg0, %arg1, %c0_i32 : i32, i32, i32
  }
  func.func @transform_6(%arg0: i32, %arg1: i32) -> (i32, i32, i32, i32) {
    %c0_i32 = arith.constant 0 : i32
    %c0_i32_0 = arith.constant 0 : i32
    %c0_i32_1 = arith.constant 0 : i32
    return %arg0, %c0_i32, %arg1, %c0_i32_0 : i32, i32, i32, i32
  }
  func.func @transform_7(%arg0: i32, %arg1: i32) -> (i32, i32, i32, i32) {
    %c0_i32 = arith.constant 0 : i32
    %c0_i32_0 = arith.constant 0 : i32
    %c0_i32_1 = arith.constant 0 : i32
    return %arg0, %c0_i32, %arg1, %c0_i32_0 : i32, i32, i32, i32
  }
}

</mosaic_0001>

<bundles_post_ra>
// kernel: tpu_custom_call.1
= control target key start
LH: loop header
LB: loop body
LE: loop exit
PB: predicated region body
PF: predicated region fallthrough
CT: control target
= control target key end

     0   :  { %s2725_s0 = inlined_call_operand.hbm [shape: f32[2,8,32], index: 0, kind: input, shape index: {}]   ;;  %s2726_s1 = inlined_call_operand.hbm [shape: f32[2,8,32], index: 1, kind: input, shape index: {}]   ;;  %s2727_s2 = inlined_call_operand.hbm [shape: f32[2,8,32], index: 2, kind: input, shape index: {}]   ;;  %s2728_s3 = inlined_call_operand.hbm [shape: f32[32,32], index: 3, kind: input, shape index: {}]   ;;  %s2729_s4 = inlined_call_operand.vmem [shape: f32[1,32], index: 4, kind: input, shape index: {}]   ;;  %s2730_s5 = inlined_call_operand.hbm [shape: f32[2,8,32], index: 5, kind: output, shape index: {0}]   ;;  %s2731_s6 = inlined_call_operand.hbm [shape: f32[2,4,8,8], index: 6, kind: output, shape index: {1}]   ;;  %s2732_s7 = inlined_call_operand.hbm [shape: f32[2,4,8,8], index: 7, kind: output, shape index: {2}]  }
   0x1   :  { %2753 = sst [smem:[#allocation25_spill]] %s2726_s1 }
   0x2   :  { %2754 = sst [smem:[#allocation26_spill]] %s2729_s4 }
   0x3   :  { %2755 = sst [smem:[#allocation27_spill]] %s2730_s5 }
   0x4   :  { %2756 = sst [smem:[#allocation28_spill]] %s2731_s6 }
   0x5   :  { %2757 = sst [smem:[#allocation29_spill]] %s2732_s7 }
   0x6   :  { %13 = vsyncpa [#allocation3], 0 }
   0x7   :  { %15 = vsyncpa [#allocation3 + $0x1], 0 }
   0x8   :  { %16 = vsyncpa [#allocation6], 0 }
   0x9   :  { %18 = vsyncpa [#allocation6 + $0x1], 0 }
   0xa   :  { %19 = vsyncpa [#allocation9], 0 }
   0xb   :  { %20 = vsyncpa [#allocation4], 0 }
   0xc   :  { %22 = vsyncpa [#allocation4 + $0x1], 0 }
   0xd   :  { %23 = vsyncpa [#allocation12], 0 }
   0xe   :  { %25 = vsyncpa [#allocation12 + $0x1], 0  ;;  %s2232_s24 = smov 0   ;;  %s2234_s25 = smov 0  }
   0xf   :  { %s2236_s26 = smov 0   ;;  %s2238_s27 = smov 0  }
  0x10   :  { %s2240_s28 = smov 0   ;;  %s2242_s29 = smov 0  }
  0x11 LB: > { %2758 = sst [smem:[#allocation19_spill]] %s2154_s24  ;;  %s43_s30 = sadd.s32 1, %s2170_s28  ;;  %s2174_s29 = sphi %s2242_s29, %s31_s29   ;;  %s2170_s28 = sphi %s2240_s28, %s2795_s28   ;;  %s2166_s27 = sphi %s2238_s27, %s2794_s27   ;;  %s2162_s26 = sphi %s2236_s26, %s2798_s26   ;;  %s2158_s25 = sphi %s2234_s25, %s2797_s25   ;;  %s2154_s24 = sphi %s2232_s24, %s2796_s24  }
  0x12   : > { %2759 = sst [smem:[#allocation20_spill]] %s2170_s28  ;;  %s52_s8 = sadd.s32 1, %s2162_s26 }
  0x13   : > { %2760 = sst [smem:[#allocation21_spill]] %s2174_s29  ;;  %p45_p0 = scmp.ge.s32.totalorder %s43_s30, 2 }
  0x14   : > { %p2733_p1 = scmp.ne.s32.totalorder %s2162_s26, %s2158_s25  ;;  %p60_p2 = scmp.eq.s32.totalorder %s2174_s29, 0 }
  0x15   : > { %s2800_s30 = smov (%p45_p0, %s43_s30), 0  ;;  %p1829_p5 = scmp.lt.s32.totalorder %s2174_s29, 2 }
  0x16   : > { %2761 = sst [smem:[#allocation22_spill]] %s2800_s30  ;;  %p61_p4 = por %p60_p2, %p2733_p1 }
  0x17   : > { %s47_s9 = ssub.s32 %s2170_s28, %s2800_s30  ;;  %s2735_s10 = sand.u32 1, %s2162_s26  }
  0x18   : > { %p50_p6 = scmp.eq.s32.totalorder %s47_s9, 0  ;;  %s2279_s11 = sshll.u32 %s2735_s10, 3 }
  0x19   : > { %s2282_s12 = sshll.u32 %s2170_s28, 7  ;;  %p2284_p7 = pnand %p1829_p5, %p61_p4 }
  0x1a   : > { %s2289_s14 = scalar_select %p50_p6, %s2162_s26, %s52_s8  }
  0x1b   : > { %s2762_s13 = scalar_select %p2284_p7, 1, 0 }
  0x1c   : > { %2763 = sst [smem:[#allocation23_spill]] %s2289_s14  ;;  %s302_s15 = sand.u32 1, %s2174_s29  }
  0x1d   : > { %s2764_s1 = sld [smem:[#allocation25_spill]]  ;;  %s306_s19 = scalar_lea.vmem [#allocation5], %s2279_s11 }
  0x1e   : > { %s313_s20 = sshll.u32 %s306_s19, 4  ;;  %s2301_s21 = scalar_lea.sflag [#allocation6], %s302_s15  ;;  %s2299_s20 = int_to_ptr.vmem [resolvable:$true] %s313_s20 }
  0x1f   : > { %p2307_p9 = pneg %p2284_p7 }
  0x21   : > { %s2765_s23 = scalar_select %p2307_p9, 1, 0 }
  0x23   : > { %s2296_s18 = scalar_lea.hbm %s2764_s1, %s2282_s12  ;;  %s1911_s16 = scalar_lea.hbm %s2764_s1, 256 }
  0x24   : > { %s1906_s22 = scalar_lea.hbm %s2296_s18, 128  ;;  %p1912_p12 = scmp.lt.u32.totalorder %s2296_s18, %s2764_s1 }
  0x25   : > { %p1907_p8 = scmp.ne.s32.totalorder %s2296_s18, %s1906_s22  ;;  %p1913_p13 = scmp.lt.u32.totalorder %s1911_s16, %s1906_s22 }
  0x26   : > { %p1915_p2 = scmp.lt.u32.totalorder %s1906_s22, %s2296_s18 }
  0x27   : > { %p1909_p10 = pnand %p2307_p9, %p1907_p8  ;;  %p1914_p0 = por %p1913_p13, %p1912_p12 }
  0x29   : > { %p1910_p11 = pneg %p1909_p10  ;;  %p1916_p4 = por %p1915_p2, %p1914_p0 }
  0x2b   : > { %p1917_p5 = pnand %p1916_p4, %p1910_p11 }
  0x2d   : > { %1920 = shalt.err (!%p1917_p5)
}
  0x2e   : > { %s1921_s15 = scalar_lea.vmem %s2299_s20, 128  ;;  %s2176_s8 = smov [#allocation5]  }
  0x2f   : > { %p1922_p6 = scmp.ne.s32.totalorder %s2299_s20, %s1921_s15  ;;  %s1926_s9 = sshll.u32 %s2176_s8, 4  ;;  %s1927_s9 = int_to_ptr.vmem [resolvable:$false] %s1926_s9 }
  0x30   : > { %s1928_s17 = scalar_lea.vmem %s1927_s9, 256  ;;  %p1929_p3 = scmp.lt.s32.totalorder %s2299_s20, %s1927_s9 }
  0x31   : > { %p1924_p8 = pnand %p1922_p6, %p2307_p9  ;;  %p1930_p1 = scmp.lt.s32.totalorder %s1928_s17, %s1921_s15 }
  0x33   : > { %p1925_p10 = pneg %p1924_p8  ;;  %p1931_p12 = por %p1930_p1, %p1929_p3 }
  0x35   : > { %p1932_p13 = pnand %p1931_p12, %p1925_p10 }
  0x37   : > { %1935 = shalt.err (!%p1932_p13)
}
  0x38   : > { %1814 = dma.hbm_to_vmem [thread:$0]  (!%p2284_p7), %s2296_s18, 128, %s2299_s20, %s2301_s21  }
  0x39   : > { %s2332_s22 = sadd.s32 4294967295, %s2174_s29   ;;  %s2734_s16 = sadd.s32 4294967294, %s2174_s29  }
  0x3a   : > { %p65_p1 = scmp.ne.s32.totalorder %s2158_s25, %s2154_s24  ;;  %p2742_p3 = scmp.eq.s32.totalorder %s2332_s22, 0 }
  0x3b   : > { %p185_p11 = scmp.eq.s32.totalorder %s2332_s22, 1  ;;  %p191_p0 = scmp.eq.s32.totalorder %s2734_s16, 1 }
  0x3c   : > { %p1658_p2 = scmp.ge.s32.totalorder %s2174_s29, 1  ;;  %p2344_p4 = por %p2742_p3, %p65_p1 }
  0x3d   : > { %p2767_p5 = scmp.ne.s32.totalorder %s2162_s26, %s2158_s25  ;;  %p2355_p8 = por %p191_p0, %p65_p1 }
  0x3e   : > { %s2766_s19 = scalar_select %p2344_p4, 1, 0 }
  0x3f   : > { %p2351_p6 = por %p185_p11, %p2767_p5  ;;  %p254_p10 = scmp.lt.s32.totalorder %s2174_s29, 3 }
  0x40   : > { %s2769_s20 = scalar_select %p2355_p8, 1, 0 }
  0x41   : > { %s2768_s18 = scalar_select %p2351_p6, 1, 0 }
  0x42   : > { %2770 = sst [smem:[#allocation24_spill]] %s2769_s20  ;;  %p2360_p12 = pnand %p1658_p2, %p254_p10 }
  0x43   : > { %s2177_s8 = smov [#allocation8]   ;;  %s2378_s1 = scalar_lea.hbm %s2725_s0, %s2282_s12 }
  0x44   : > { %s2771_s15 = scalar_select %p2360_p12, 1, 0 }
  0x45   : > { %s266_s9 = sshll.u32 %s2177_s8, 4  ;;  %p1804_p13 = pneg %p2360_p12  ;;  %s2364_s9 = int_to_ptr.vmem [resolvable:$true] %s266_s9 }
  0x46   : > { %s287_s30 = scalar_lea.vmem [#allocation2], %s2279_s11  ;;  %s1936_s29 = scalar_lea.hbm %s2728_s3, 512 }
  0x47   : > { %p2370_p11 = pnand %p1804_p13, %p2742_p3  ;;  %s295_s28 = sshll.u32 %s287_s30, 4  ;;  %s2381_s28 = int_to_ptr.vmem [resolvable:$true] %s295_s28 }
  0x48   : > { %p1937_p1 = scmp.ne.s32.totalorder %s2728_s3, %s1936_s29  ;;  %p1943_p10 = scmp.lt.u32.totalorder %s1936_s29, %s2728_s3 }
  0x49   : > { %p1938_p0 = pneg %p2370_p11 }
  0x4b   : > { %p1939_p2 = pnand %p1938_p0, %p1937_p1 }
  0x4d   : > { %p1940_p5 = pneg %p1939_p2 }
  0x4f   : > { %p1945_p13 = pnand %p1943_p10, %p1940_p5 }
  0x51   : > { %1948 = shalt.err (!%p1945_p13)
}
  0x52   : > { %s1949_s30 = scalar_lea.vmem %s2364_s9, 512  ;;  %p1957_p4 = scmp.lt.s32.totalorder %s2364_s9, %s2364_s9 }
  0x53   : > { %p1950_p3 = scmp.ne.s32.totalorder %s2364_s9, %s1949_s30  ;;  %p1958_p12 = scmp.lt.s32.totalorder %s1949_s30, %s1949_s30 }
  0x55   : > { %p1952_p8 = pnand %p1950_p3, %p1938_p0  ;;  %p1959_p7 = por %p1958_p12, %p1957_p4 }
  0x57   : > { %p1953_p6 = pneg %p1952_p8 }
  0x59   : > { %p1960_p9 = pnand %p1959_p7, %p1953_p6 }
  0x5b   : > { %1963 = shalt.err (!%p1960_p9)
}
  0x5c   : > { %s2178_s24 = smov 128   ;;  %s2179_s29 = smov 8  }
  0x5d   : > { %1807 = dma.hbm_to_vmem [thread:$0]  (!%p2370_p11), %s2728_s3, 512, %s2364_s9, [#allocation9], %s2178_s24, %s2178_s24, %s2179_s29  }
  0x5e   : > { %s2773_s8 = sand.u32 1, %s2162_s26   ;;  %s1964_s16 = scalar_lea.hbm %s2378_s1, 128 }
  0x5f   : > { %s284_s10 = scalar_lea.sflag [#allocation3], %s2773_s8  ;;  %p1965_p7 = scmp.ne.s32.totalorder %s2378_s1, %s1964_s16 }
  0x60   : > { %p2774_p9 = scmp.ne.s32.totalorder %s2765_s23, 0  ;;  %s1969_s4 = scalar_lea.hbm %s2725_s0, 256 }
  0x61   : > { %p1970_p6 = scmp.lt.u32.totalorder %s2378_s1, %s2725_s0  ;;  %p1971_p8 = scmp.lt.u32.totalorder %s1969_s4, %s1964_s16 }
  0x62   : > { %p1967_p3 = pnand %p1965_p7, %p2774_p9  ;;  %p1973_p1 = scmp.lt.u32.totalorder %s1964_s16, %s2378_s1 }
  0x63   : > { %p1972_p12 = por %p1971_p8, %p1970_p6 }
  0x64   : > { %p1968_p4 = pneg %p1967_p3 }
  0x65   : > { %p1974_p0 = por %p1973_p1, %p1972_p12 }
  0x67   : > { %p1975_p11 = pnand %p1974_p0, %p1968_p4 }
  0x69   : > { %1978 = shalt.err (!%p1975_p11)
}
  0x6a   : > { %s1979_s9 = scalar_lea.vmem %s2381_s28, 128  ;;  %s2180_s5 = smov [#allocation2]  }
  0x6b   : > { %p1980_p2 = scmp.ne.s32.totalorder %s2381_s28, %s1979_s9  ;;  %s1984_s17 = sshll.u32 %s2180_s5, 4  ;;  %s1985_s17 = int_to_ptr.vmem [resolvable:$false] %s1984_s17 }
  0x6c   : > { %s1986_s6 = scalar_lea.vmem %s1985_s17, 256  ;;  %p1987_p13 = scmp.lt.s32.totalorder %s2381_s28, %s1985_s17 }
  0x6d   : > { %p1982_p5 = pnand %p1980_p2, %p2774_p9  ;;  %p1988_p7 = scmp.lt.s32.totalorder %s1986_s6, %s1979_s9 }
  0x6f   : > { %p1983_p10 = pneg %p1982_p5  ;;  %p1989_p3 = por %p1988_p7, %p1987_p13 }
  0x71   : > { %p1990_p6 = pnand %p1989_p3, %p1983_p10 }
  0x73   : > { %1993 = shalt.err (!%p1990_p6)
}
  0x74   : > { %p2775_p4 = scmp.ne.s32.totalorder %s2762_s13, 0  ;;  %s2431_s24 = scalar_lea.hbm %s2727_s2, %s2282_s12 }
  0x75   : > { %s324_s29 = scalar_lea.vmem [#allocation7], %s2279_s11  ;;  %s1994_s20 = scalar_lea.hbm %s2431_s24, 128 }
  0x76   : > { %1811 = dma.hbm_to_vmem [thread:$0]  (!%p2775_p4), %s2378_s1, 128, %s2381_s28, %s284_s10  }
  0x77   : > { %s331_s14 = sshll.u32 %s324_s29, 4  ;;  %p1995_p8 = scmp.ne.s32.totalorder %s2431_s24, %s1994_s20  ;;  %s332_s14 = int_to_ptr.vmem [resolvable:$true] %s331_s14 }
  0x78   : > { %s1999_s1 = scalar_lea.hbm %s2727_s2, 256  ;;  %p2000_p0 = scmp.lt.u32.totalorder %s2431_s24, %s2727_s2 }
  0x79   : > { %p1997_p12 = pnand %p1995_p8, %p2774_p9  ;;  %p2001_p11 = scmp.lt.u32.totalorder %s1999_s1, %s1994_s20 }
  0x7a   : > { %p2003_p5 = scmp.lt.u32.totalorder %s1994_s20, %s2431_s24 }
  0x7b   : > { %p1998_p1 = pneg %p1997_p12  ;;  %p2002_p2 = por %p2001_p11, %p2000_p0 }
  0x7d   : > { %p2004_p10 = por %p2003_p5, %p2002_p2 }
  0x7f   : > { %p2005_p13 = pnand %p2004_p10, %p1998_p1 }
  0x81   : > { %2008 = shalt.err (!%p2005_p13)
}
  0x82   : > { %s2009_s11 = scalar_lea.vmem %s332_s14, 128  ;;  %s2181_s12 = smov [#allocation7]  }
  0x83   : > { %p2010_p7 = scmp.ne.s32.totalorder %s332_s14, %s2009_s11  ;;  %s2014_s30 = sshll.u32 %s2181_s12, 4  ;;  %s2015_s30 = int_to_ptr.vmem [resolvable:$false] %s2014_s30 }
  0x84   : > { %s2016_s9 = scalar_lea.vmem %s2015_s30, 256  ;;  %p2017_p8 = scmp.lt.s32.totalorder %s332_s14, %s2015_s30 }
  0x85   : > { %p2012_p3 = pnand %p2010_p7, %p2774_p9  ;;  %p2018_p12 = scmp.lt.s32.totalorder %s2016_s9, %s2009_s11 }
  0x87   : > { %p2013_p6 = pneg %p2012_p3  ;;  %p2019_p4 = por %p2018_p12, %p2017_p8 }
  0x89   : > { %p2020_p0 = pnand %p2019_p4, %p2013_p6 }
  0x8b   : > { %2023 = shalt.err (!%p2020_p0)
}
  0x8c   : > { %p2776_p11 = scmp.ne.s32.totalorder %s2762_s13, 0  ;;  %p2777_p1 = scmp.ne.s32.totalorder %s2771_s15, 0 }
  0x8d   : > { %s2455_s23 = sand.u32 (!%p2777_p1), 1, %s2158_s25   ;;  %p2778_p9 = scmp.ne.s32.totalorder (!%p2777_p1), %s2766_s19, 0 }
  0x8e   : > { %1817 = dma.hbm_to_vmem [thread:$0]  (!%p2776_p11), %s2431_s24, 128, %s332_s14, %s2301_s21  }
  0x8f   : > { %340 = sbr.rel (%p2777_p1) target bundleno = 2941 (0xb7d), region = 40  ;;  %s2458_s5 = sshll.u32 (!%p2777_p1), %s2455_s23, 3 }
  0x90   : > { %s343_s17 = scalar_lea.sflag (!%p2777_p1), [#allocation3], %s2455_s23  ;;  %s346_s6 = scalar_lea.vmem (!%p2777_p1), [#allocation2], %s2458_s5 }
  0x96   : > { %2133 = dma.done.wait (%p2778_p9), %s343_s17, 128  }
  0x97   : > { %2135 = vsyncadd (%p2778_p9), %s343_s17, 4294967168  ;;  %s351_s13 = sand.u32 1, %s2332_s22   ;;  %s355_s15 = scalar_lea.vmem [#allocation5], %s2458_s5 }
  0x98   : > { %s352_s21 = scalar_lea.sflag [#allocation6], %s351_s13 }
  0x99   : > { %2137 = dma.done.wait (%p2778_p9), %s352_s21, 256  }
  0x9a   : > { %2139 = vsyncadd (%p2778_p9), %s352_s21, 4294967040  ;;  %s364_s4 = scalar_lea.vmem [#allocation7], %s2458_s5  ;;  %p2779_p4 = scmp.eq.s32.totalorder %s2332_s22, 0 }
  0x9c   : > { %2141 = dma.done.wait (%p2779_p4), [#allocation9], 512   ;;  %p2780_p2 = pmov %p2779_p4 }
  0x9d   : > { %v2182_v0 = vmov 0.0   ;;  %vm2183_vm0 = vmmov 0   ;;  %vm422_vm1 = vcmask 64512   ;;  %v2485_v1 = vld [vmem:[%s355_s15] sm:$0xff]  ;;  %v2489_v2 = vld [vmem:[%s346_s6] sm:$0xff]  ;;  %s1673_s19 = sshll.u32 %s2455_s23, 5 }
  0x9e   : > { %2143 = vsyncadd (%p2780_p2), [#allocation9], 4294966784  ;;  %1728 = vmatprep.subr.mxu0 %v2182_v0  ;;  %1730 = vmatprep.mubr.msk.f32.mxu0 %vm2183_vm0, %v2182_v0  ;;  %s2497_s7 = scalar_lea.vmem [#allocation11], %s1673_s19  ;;  %s2184_s24 = smov 120   ;;  %v2509_v12 = vld [vmem:[%s364_s4] sm:$0xff]  ;;  %v752_v30 = vld [vmem:[#allocation8 + $0x8] sm:$0xff] }
  0x9f   : > { %1733 = vmatprep.subr.mxu1 %v2182_v0  ;;  %1735 = vmatprep.mubr.msk.f32.mxu1 %vm2183_vm0, %v2182_v0  ;;  %s2514_s29 = scalar_lea.vmem [#allocation13], %s1673_s19  ;;  %s2185_s14 = smov 112   ;;  %v584_v34 = vld [vmem:[#allocation8] sm:$0xff]  ;;  %v1065_v59 = vld [vmem:[#allocation8 + $0x10] sm:$0xff] }
  0xa0   : > { %1729 = vmatpush3.xpose.msk.msra.mxu0 %vm422_vm1, %v2485_v1  ;;  %587 = vrot.lane.b32.xlu1 %v2485_v1, %s2184_s24  ;;  %s2186_s20 = smov 104   ;;  %s1438_s8 = sshll.u32 %s2497_s7, 4  ;;  %s2589_s8 = int_to_ptr.vmem [resolvable:$true] %s1438_s8 }
  0xa1   : > { %1743 = vmatprep.subr.mxu0 %v2182_v0  ;;  %1734 = vmatpush3.msra.mxu1 %v2509_v12  ;;  %s1455_s16 = sshll.u32 %s2514_s29, 4  ;;  %s1702_s1 = sshll.u32 %s2166_s27, 9  ;;  %s2631_s16 = int_to_ptr.vmem [resolvable:$true] %s1455_s16 }
  0xa2   : > { %1738 = vmatprep.subr.mxu1 %v2182_v0  ;;  %s2781_s11 = sld [smem:[#allocation28_spill]]  ;;  %s2602_s30 = scalar_lea.sflag [#allocation12], %s351_s13 }
  0xa3   : > { %1731 = vmatmul.mubr.msk.f32.vlgmr.msra.gmra.mrb[0].mxu0 %vm422_vm1, %v2489_v2  ;;  %s2024_s9 = scalar_lea.vmem %s2589_s8, 512  ;;  %p2782_p10 = scmp.ne.s32.totalorder %s2768_s18, 0 }
  0xa4   : > { %1745 = vmatprep.mubr.msk.f32.mxu0 %vm2183_vm0, %v2182_v0  ;;  %585 = vrot.lane.b32.xlu1 %v2489_v2, %s2184_s24  ;;  %p2025_p5 = scmp.ne.s32.totalorder %s2589_s8, %s2024_s9  ;;  %s2187_s17 = smov [#allocation11]  }
  0xa5   : > { %s2028_s6 = sshll.u32 %s2187_s17, 4  ;;  %s2029_s6 = int_to_ptr.vmem [resolvable:$false] %s2028_s6 }
  0xa6   : > { %p2026_p13 = pnand %p2025_p5, %p2782_p10  ;;  %s2030_s21 = scalar_lea.vmem %s2029_s6, 1024 }
  0xa7   : > { %p2031_p3 = scmp.lt.s32.totalorder %s2589_s8, %s2029_s6  ;;  %p2032_p6 = scmp.lt.s32.totalorder %s2030_s21, %s2024_s9 }
  0xa8   : > { %s2598_s12 = scalar_lea.hbm %s2781_s11, %s1702_s1  ;;  %p2027_p7 = pneg %p2026_p13 }
  0xa9   : > { %p2033_p8 = por %p2032_p6, %p2031_p3 }
  0xab   : > { %p2034_p12 = pnand %p2033_p8, %p2027_p7 }
 0x112   : > { %v588_v14 = vpop.permute.xlu1 %587 }
 0x116   : > { %v586_v17 = vpop.permute.xlu1 %585 }
 0x176   : > { %v495_v3 = vpop.f32.mrb[0].mxu0 }
 0x177   : > { %v499_v4 = vmul.f32 0.35355338, %v495_v3  ;;  %v1732_v5 = vpop.f32.mrb[1].mxu0 }
 0x179   : > { %1391 = vst.msk [vmem:[%s2497_s7] sm:$0xff] %vm422_vm1, %v499_v4  ;;  %v500_v6 = vsel %vm422_vm1, %v499_v4, -inf }
 0x17a   : > { %501 = vmax.xlane.f32.xlu0 %v500_v6 }
 0x207   : > { %v502_v7 = vpop.xlane.xlu0 %501 }
 0x208   : > { %v503_v8 = vsub.f32 %v499_v4, %v502_v7 }
 0x20a   : > { %v504_v9 = vmul.f32 1.442695, %v503_v8  ;;  %v1306_v8 = vld [vmem:[#allocation8 + $0x18] sm:$0xff] }
 0x20c   : > { %1890 = vpow2.f32 %v504_v9 }
 0x216   : > { %v1891_v10 = vpop.eup %1890 }
 0x217   : > { %v506_v11 = vsel %vm422_vm1, %v1891_v10, 0.0 }
 0x218   : > { %507 = vadd.xlane.f32.xlu0 %v506_v11 }
 0x2a5   : > { %v508_v13 = vpop.xlane.xlu0 %507 }
 0x2a6   : > { %1892 = vrcp.f32 %v508_v13 }
 0x2b0   : > { %v1893_v15 = vpop.eup %1892 }
 0x2b1   : > { %v510_v16 = vmul.f32 %v1893_v15, %v1891_v10 }
 0x2b3   : > { %1736 = vmatmul.mubr.msk.f32.vlgmr.msra.gmra.mrb[0].mxu1 %vm422_vm1, %v510_v16  ;;  %1395 = vst.msk [vmem:[%s2514_s29] sm:$0xff] %vm422_vm1, %v510_v16 }
 0x2b4   : > { %1739 = vmatpush3.xpose.msk.msra.mxu1 %vm422_vm1, %v588_v14  ;;  %1740 = vmatprep.mubr.msk.f32.mxu1 %vm2183_vm0, %v2182_v0 }
 0x2b5   : > { %1748 = vmatprep.subr.mxu1 %v2182_v0 }
 0x2b7   : > { %1741 = vmatmul.mubr.msk.f32.vlgmr.msra.gmra.mrb[2].mxu1 %vm422_vm1, %v586_v17 }
 0x2b8   : > { %1750 = vmatprep.mubr.msk.f32.mxu1 %vm2183_vm0, %v2182_v0  ;;  %1749 = vmatpush3.msra.mxu1 %v752_v30 }
 0x2b9   : > { %1758 = vmatprep.subr.mxu1 %v2182_v0 }
 0x386   : > { %v580_v18 = vpop.f32.mrb[0].mxu1 }
 0x387   : > { %v1737_v19 = vpop.f32.mrb[1].mxu1 }
 0x38a   : > { %v659_v20 = vpop.f32.mrb[2].mxu1 }
 0x38b   : > { %v663_v21 = vmul.f32 0.35355338, %v659_v20  ;;  %v1742_v22 = vpop.f32.mrb[3].mxu1 }
 0x38d   : > { %1392 = vst.msk [vmem:[%s2497_s7 + $0x8] sm:$0xff] %vm422_vm1, %v663_v21  ;;  %v664_v23 = vsel %vm422_vm1, %v663_v21, -inf }
 0x38e   : > { %665 = vmax.xlane.f32.xlu0 %v664_v23 }
 0x3a4   : > { %676 = vrot.lane.b32.xlu0 %v2509_v12, %s2184_s24 }
 0x3a8   : > { %901 = vrot.lane.b32.xlu0 %v2485_v1, %s2185_s14 }
 0x3ac   : > { %899 = vrot.lane.b32.xlu0 %v2489_v2, %s2185_s14 }
 0x41b   : > { %v666_v24 = vpop.xlane.xlu0 %665 }
 0x41c   : > { %v667_v25 = vsub.f32 %v663_v21, %v666_v24 }
 0x41e   : > { %v668_v26 = vmul.f32 1.442695, %v667_v25 }
 0x41f   : > { %v677_v29 = vpop.permute.xlu0 %676 }
 0x420   : > { %1894 = vpow2.f32 %v668_v26  ;;  %1744 = vmatpush3.msra.mxu0 %v677_v29 }
 0x421   : > { %1753 = vmatprep.subr.mxu0 %v2182_v0 }
 0x423   : > { %v902_v35 = vpop.permute.xlu0 %901 }
 0x427   : > { %v900_v38 = vpop.permute.xlu0 %899 }
 0x42a   : > { %v1895_v27 = vpop.eup %1894 }
 0x42b   : > { %v670_v28 = vsel %vm422_vm1, %v1895_v27, 0.0 }
 0x42c   : > { %671 = vadd.xlane.f32.xlu1 %v670_v28 }
 0x43d   : > { %989 = vrot.lane.b32.xlu1 %v2509_v12, %s2185_s14 }
 0x441   : > { %1142 = vrot.lane.b32.xlu1 %v2485_v1, %s2186_s20 }
 0x4b9   : > { %v672_v31 = vpop.xlane.xlu1 %671 }
 0x4ba   : > { %1896 = vrcp.f32 %v672_v31 }
 0x4bd   : > { %v990_v48 = vpop.permute.xlu1 %989 }
 0x4c1   : > { %v1143_v54 = vpop.permute.xlu1 %1142 }
 0x4c4   : > { %v1897_v32 = vpop.eup %1896 }
 0x4c5   : > { %v674_v33 = vmul.f32 %v1897_v32, %v1895_v27 }
 0x4c7   : > { %1396 = vst.msk [vmem:[%s2514_s29 + $0x8] sm:$0xff] %vm422_vm1, %v674_v33  ;;  %1746 = vmatmul.mubr.msk.f32.vlgmr.msra.gmra.mrb[2].mxu0 %vm422_vm1, %v674_v33 }
 0x4c8   : > { %1754 = vmatpush3.msra.mxu0 %v584_v34  ;;  %1755 = vmatprep.mubr.msk.f32.mxu0 %vm2183_vm0, %v2182_v0 }
 0x4c9   : > { %1763 = vmatprep.subr.mxu0 %v2182_v0 }
 0x4cb   : > { %1756 = vmatmul.mubr.msk.f32.vlgmr.msra.gmra.mrb[4].mxu0 %vm422_vm1, %v580_v18 }
 0x4cc   : > { %1765 = vmatprep.mubr.msk.f32.mxu0 %vm2183_vm0, %v2182_v0  ;;  %1764 = vmatpush3.msra.mxu0 %v990_v48 }
 0x4cd   : > { %1773 = vmatprep.subr.mxu0 %v2182_v0 }
 0x59a   : > { %v748_v36 = vpop.f32.mrb[2].mxu0 }
 0x59b   : > { %v1747_v37 = vpop.f32.mrb[3].mxu0  ;;  %1751 = vmatmul.mubr.msk.f32.vlgmr.msra.gmra.mrb[4].mxu1 %vm422_vm1, %v748_v36 }
 0x59c   : > { %1759 = vmatpush3.xpose.msk.msra.mxu1 %vm422_vm1, %v902_v35  ;;  %1760 = vmatprep.mubr.msk.f32.mxu1 %vm2183_vm0, %v2182_v0 }
 0x59d   : > { %1768 = vmatprep.subr.mxu1 %v2182_v0 }
 0x59e   : > { %v895_v39 = vpop.f32.mrb[4].mxu0 }
 0x59f   : > { %v1757_v40 = vpop.f32.mrb[5].mxu0  ;;  %1761 = vmatmul.mubr.msk.f32.vlgmr.msra.gmra.mrb[6].mxu1 %vm422_vm1, %v900_v38 }
 0x5a0   : > { %1770 = vmatprep.mubr.msk.f32.mxu1 %vm2183_vm0, %v2182_v0  ;;  %1769 = vmatpush3.msra.mxu1 %v1065_v59 }
 0x5a1   : > { %1778 = vmatprep.subr.mxu1 %v2182_v0 }
 0x66e   : > { %v822_v41 = vpop.f32.mrb[4].mxu1 }
 0x66f   : > { %v896_v42 = vadd.f32 %v895_v39, %v822_v41  ;;  %v1752_v43 = vpop.f32.mrb[5].mxu1 }
 0x672   : > { %v973_v44 = vpop.f32.mrb[6].mxu1 }
 0x673   : > { %v977_v45 = vmul.f32 0.35355338, %v973_v44  ;;  %v1762_v46 = vpop.f32.mrb[7].mxu1 }
 0x675   : > { %1393 = vst.msk [vmem:[%s2497_s7 + $0x10] sm:$0xff] %vm422_vm1, %v977_v45  ;;  %v978_v47 = vsel %vm422_vm1, %v977_v45, -inf }
 0x676   : > { %979 = vmax.xlane.f32.xlu0 %v978_v47 }
 0x703   : > { %v980_v49 = vpop.xlane.xlu0 %979 }
 0x704   : > { %v981_v50 = vsub.f32 %v977_v45, %v980_v49 }
 0x706   : > { %v982_v51 = vmul.f32 1.442695, %v981_v50 }
 0x708   : > { %1898 = vpow2.f32 %v982_v51 }
 0x712   : > { %v1899_v52 = vpop.eup %1898 }
 0x713   : > { %v984_v53 = vsel %vm422_vm1, %v1899_v52, 0.0 }
 0x714   : > { %985 = vadd.xlane.f32.xlu1 %v984_v53 }
 0x725   : > { %1140 = vrot.lane.b32.xlu1 %v2489_v2, %s2186_s20 }
 0x7a1   : > { %v986_v55 = vpop.xlane.xlu1 %985 }
 0x7a2   : > { %1900 = vrcp.f32 %v986_v55 }
 0x7a5   : > { %v1141_v58 = vpop.permute.xlu1 %1140 }
 0x7ac   : > { %v1901_v56 = vpop.eup %1900 }
 0x7ad   : > { %v988_v57 = vmul.f32 %v1901_v56, %v1899_v52 }
 0x7af   : > { %1397 = vst.msk [vmem:[%s2514_s29 + $0x10] sm:$0xff] %vm422_vm1, %v988_v57  ;;  %1766 = vmatmul.mubr.msk.f32.vlgmr.msra.gmra.mrb[6].mxu0 %vm422_vm1, %v988_v57 }
 0x7b0   : > { %1774 = vmatpush3.xpose.msk.msra.mxu0 %vm422_vm1, %v1143_v54  ;;  %1775 = vmatprep.mubr.msk.f32.mxu0 %vm2183_vm0, %v2182_v0 }
 0x7b1   : > { %1783 = vmatprep.subr.mxu0 %v2182_v0 }
 0x7b3   : > { %1776 = vmatmul.mubr.msk.f32.vlgmr.msra.gmra.mrb[8].mxu0 %vm422_vm1, %v1141_v58 }
 0x7b4   : > { %1785 = vmatprep.mubr.msk.f32.mxu0 %vm2183_vm0, %v2182_v0  ;;  %1784 = vmatpush3.msra.mxu0 %v1306_v8 }
 0x882   : > { %v1061_v60 = vpop.f32.mrb[6].mxu0 }
 0x883   : > { %v1767_v61 = vpop.f32.mrb[7].mxu0  ;;  %1771 = vmatmul.mubr.msk.f32.vlgmr.msra.gmra.mrb[8].mxu1 %vm422_vm1, %v1061_v60 }
 0x884   : > { %1780 = vmatprep.mubr.msk.f32.mxu1 %vm2183_vm0, %v2182_v0 }
 0x886   : > { %v1214_v62 = vpop.f32.mrb[8].mxu0 }
 0x887   : > { %v1218_v63 = vmul.f32 0.35355338, %v1214_v62  ;;  %v1777_v1 = vpop.f32.mrb[9].mxu0 }
 0x889   : > { %1394 = vst.msk [vmem:[%s2497_s7 + $0x18] sm:$0xff] %vm422_vm1, %v1218_v63  ;;  %v1219_v2 = vsel %vm422_vm1, %v1218_v63, -inf }
 0x88a   : > { %1220 = vmax.xlane.f32.xlu0 %v1219_v2 }
 0x8a0   : > { %1230 = vrot.lane.b32.xlu0 %v2509_v12, %s2186_s20 }
 0x917   : > { %v1221_v3 = vpop.xlane.xlu0 %1220 }
 0x918   : > { %v1222_v4 = vsub.f32 %v1218_v63, %v1221_v3 }
 0x91a   : > { %v1223_v5 = vmul.f32 1.442695, %v1222_v4 }
 0x91b   : > { %v1231_v0 = vpop.permute.xlu0 %1230 }
 0x91c   : > { %1902 = vpow2.f32 %v1223_v5  ;;  %1779 = vmatpush3.msra.mxu1 %v1231_v0 }
 0x926   : > { %v1903_v6 = vpop.eup %1902 }
 0x927   : > { %v1225_v7 = vsel %vm422_vm1, %v1903_v6, 0.0 }
 0x928   : > { %1226 = vadd.xlane.f32.xlu1 %v1225_v7 }
 0x956   : > { %v1135_v9 = vpop.f32.mrb[8].mxu1 }
 0x957   : > { %v2582_v10 = vadd.f32 %v1135_v9, %v896_v42  ;;  %v1772_v11 = vpop.f32.mrb[9].mxu1 }
 0x9b5   : > { %v1227_v12 = vpop.xlane.xlu1 %1226 }
 0x9b6   : > { %1904 = vrcp.f32 %v1227_v12 }
 0x9c0   : > { %v1905_v13 = vpop.eup %1904 }
 0x9c1   : > { %v1229_v14 = vmul.f32 %v1905_v13, %v1903_v6 }
 0x9c3   : > { %1398 = vst.msk [vmem:[%s2514_s29 + $0x18] sm:$0xff] %vm422_vm1, %v1229_v14  ;;  %1781 = vmatmul.mubr.msk.f32.vlgmr.msra.gmra.mrb[10].mxu1 %vm422_vm1, %v1229_v14 }
 0xa96   : > { %v1302_v15 = vpop.f32.mrb[10].mxu1 }
 0xa97   : > { %v1782_v16 = vpop.f32.mrb[11].mxu1  ;;  %1786 = vmatmul.mubr.msk.f32.vlgmr.msra.gmra.mrb[10].mxu0 %vm422_vm1, %v1302_v15 }
 0xa98   : > { %2037 = shalt.err (!%p2034_p12)
}
 0xa99   : > { %s2038_s22 = scalar_lea.hbm %s2598_s12, 512  ;;  %s2042_s4 = scalar_lea.hbm %s2781_s11, 1024 }
 0xa9a   : > { %p2039_p0 = scmp.ne.s32.totalorder %s2598_s12, %s2038_s22  ;;  %p2043_p9 = scmp.lt.u32.totalorder %s2598_s12, %s2781_s11 }
 0xa9b   : > { %p2044_p4 = scmp.lt.u32.totalorder %s2042_s4, %s2038_s22  ;;  %p2046_p5 = scmp.lt.u32.totalorder %s2038_s22, %s2598_s12 }
 0xa9c   : > { %p2040_p11 = pnand %p2039_p0, %p2782_p10 }
 0xa9d   : > { %p2045_p2 = por %p2044_p4, %p2043_p9 }
 0xa9e   : > { %p2041_p1 = pneg %p2040_p11 }
 0xa9f   : > { %p2047_p13 = por %p2046_p5, %p2045_p2 }
 0xaa1   : > { %p2048_p7 = pnand %p2047_p13, %p2041_p1 }
 0xaa3   : > { %2051 = shalt.err (!%p2048_p7)
}
 0xaa4   : > { %s2188_s24 = smov 128   ;;  %s2189_s14 = smov 8  }
 0xaa5   : > { %1799 = dma.vmem_to_hbm [thread:$0]  (%p2782_p10), %s2589_s8, 512, %s2598_s12, %s2602_s30, %s2188_s24, %s2188_s24, %s2189_s14  }
 0xaa6   : > { %s2783_s10 = sld [smem:[#allocation29_spill]]  ;;  %s2052_s17 = scalar_lea.vmem %s2631_s16, 512 }
 0xaa7   : > { %p2053_p3 = scmp.ne.s32.totalorder %s2631_s16, %s2052_s17  ;;  %s2190_s6 = smov [#allocation13]  }
 0xaa8   : > { %s2056_s21 = sshll.u32 %s2190_s6, 4  ;;  %s2057_s21 = int_to_ptr.vmem [resolvable:$false] %s2056_s21 }
 0xaa9   : > { %p2054_p6 = pnand %p2053_p3, %p2782_p10  ;;  %s2058_s29 = scalar_lea.vmem %s2057_s21, 1024 }
 0xaaa   : > { %p2059_p12 = scmp.lt.s32.totalorder %s2631_s16, %s2057_s21  ;;  %p2060_p0 = scmp.lt.s32.totalorder %s2058_s29, %s2052_s17 }
 0xaab   : > { %p2055_p8 = pneg %p2054_p6 }
 0xaac   : > { %s2638_s9 = scalar_lea.hbm %s2783_s10, %s1702_s1  ;;  %p2061_p11 = por %p2060_p0, %p2059_p12 }
 0xaae   : > { %p2062_p1 = pnand %p2061_p11, %p2055_p8 }
 0xab0   : > { %2065 = shalt.err (!%p2062_p1)
}
 0xab1   : > { %s2066_s8 = scalar_lea.hbm %s2638_s9, 512  ;;  %s2070_s22 = scalar_lea.hbm %s2783_s10, 1024 }
 0xab2   : > { %p2067_p9 = scmp.ne.s32.totalorder %s2638_s9, %s2066_s8  ;;  %p2071_p5 = scmp.lt.u32.totalorder %s2638_s9, %s2783_s10 }
 0xab3   : > { %p2072_p13 = scmp.lt.u32.totalorder %s2070_s22, %s2066_s8  ;;  %p2074_p3 = scmp.lt.u32.totalorder %s2066_s8, %s2638_s9 }
 0xab4   : > { %p2068_p4 = pnand %p2067_p9, %p2782_p10 }
 0xab5   : > { %p2073_p7 = por %p2072_p13, %p2071_p5 }
 0xab6   : > { %p2069_p2 = pneg %p2068_p4 }
 0xab7   : > { %p2075_p6 = por %p2074_p3, %p2073_p7 }
 0xab9   : > { %p2076_p8 = pnand %p2075_p6, %p2069_p2 }
 0xabb   : > { %2079 = shalt.err (!%p2076_p8)
}
 0xabc   : > { %1800 = dma.vmem_to_hbm [thread:$0]  (%p2782_p10), %s2631_s16, 512, %s2638_s9, %s2602_s30, %s2188_s24, %s2188_s24, %s2189_s14   ;;  %vm1389_vm2 = vcmask 261120  }
 0xabd   : > { %s2784_s7 = sld [smem:[#allocation26_spill]]  ;;  %s1695_s20 = sshll.u32 %s2166_s27, 7 }
 0xabe   : > { %s404_s28 = scalar_lea.vmem [#allocation10], %s2458_s5  ;;  %s2785_s29 = sld [smem:[#allocation27_spill]] }
 0xabf   : > { %s1424_s17 = sshll.u32 %s404_s28, 4  ;;  %s1400_s16 = scalar_lea.sflag [#allocation4], %s2455_s23  ;;  %s2676_s17 = int_to_ptr.vmem [resolvable:$true] %s1424_s17 }
 0xac0   : > { %s2080_s27 = scalar_lea.vmem %s2676_s17, 128  ;;  %s2191_s5 = smov [#allocation10]  }
 0xac1   : > { %p2081_p12 = scmp.ne.s32.totalorder %s2676_s17, %s2080_s27  ;;  %s2084_s30 = sshll.u32 %s2191_s5, 4  ;;  %s2085_s30 = int_to_ptr.vmem [resolvable:$false] %s2084_s30 }
 0xac2   : > { %s2086_s24 = scalar_lea.vmem %s2085_s30, 256  ;;  %p2087_p1 = scmp.lt.s32.totalorder %s2676_s17, %s2085_s30 }
 0xac3   : > { %v1691_v18 = vld [vmem:[%s2784_s7] ss:$0 sm:$0xff]  ;;  %p2082_p0 = pnand %p2081_p12, %p2782_p10  ;;  %p2088_p9 = scmp.lt.s32.totalorder %s2086_s24, %s2080_s27 }
 0xac4   : > { %s2786_s8 = smov %s2785_s29  ;;  %s2674_s1 = scalar_lea.hbm %s2785_s29, %s1695_s20 }
 0xac5   : > { %p2083_p11 = pneg %p2082_p0  ;;  %p2089_p4 = por %p2088_p9, %p2087_p1 }
 0xac7   : > { %p2090_p2 = pnand %p2089_p4, %p2083_p11 }
 0xb6a   : > { %v1376_v17 = vpop.f32.mrb[10].mxu0 }
 0xb6b   : > { %v1380_v19 = vadd.f32 %v1376_v17, %v2582_v10  ;;  %v1787_v20 = vpop.f32.mrb[11].mxu0 }
 0xb6d   : > { %v1388_v21 = vadd.f32 %v1691_v18, %v1380_v19 }
 0xb6f   : > { %1390 = vst.msk [vmem:[%s404_s28] sm:$0xff] %vm1389_vm2, %v1388_v21 }
 0xb70   : > { %2093 = shalt.err (!%p2090_p2)
}
 0xb71   : > { %s2094_s23 = scalar_lea.hbm %s2674_s1, 128  ;;  %s2098_s12 = scalar_lea.hbm %s2786_s8, 256 }
 0xb72   : > { %p2095_p5 = scmp.ne.s32.totalorder %s2674_s1, %s2094_s23  ;;  %p2099_p3 = scmp.lt.u32.totalorder %s2674_s1, %s2786_s8 }
 0xb73   : > { %p2100_p6 = scmp.lt.u32.totalorder %s2098_s12, %s2094_s23  ;;  %p2102_p12 = scmp.lt.u32.totalorder %s2094_s23, %s2674_s1 }
 0xb74   : > { %p2096_p13 = pnand %p2095_p5, %p2782_p10 }
 0xb75   : > { %p2101_p8 = por %p2100_p6, %p2099_p3 }
 0xb76   : > { %p2097_p7 = pneg %p2096_p13 }
 0xb77   : > { %p2103_p0 = por %p2102_p12, %p2101_p8 }
 0xb79   : > { %p2104_p11 = pnand %p2103_p0, %p2097_p7 }
 0xb7b   : > { %2107 = shalt.err (!%p2104_p11)
}
 0xb7c   : > { %1798 = dma.vmem_to_hbm [thread:$0]  (%p2782_p10), %s2676_s17, 128, %s2674_s1, %s1400_s16  }
 0xb7d PF: > { %s2787_s15 = sld [smem:[#allocation19_spill]]  ;;  %s2788_s4 = sld [smem:[#allocation24_spill]] }
 0xb7e   : > { %s2789_s19 = sld [smem:[#allocation21_spill]] }
 0xb83   : > { %s1470_s7 = sand.u32 1, %s2787_s15   ;;  %p2790_p1 = scmp.ne.s32.totalorder %s2788_s4, 0 }
 0xb84   : > { %p2791_p9 = scmp.ge.s32.totalorder %s2789_s19, 2  ;;  %s1471_s20 = scalar_lea.sflag [#allocation4], %s1470_s7 }
 0xb86   : > { %p1819_p4 = pnand %p2791_p9, %p2790_p1 }
 0xb88   : > { %2145 = dma.done.wait (!%p1819_p4), %s1471_s20, 128  }
 0xb89   : > { %2147 = vsyncadd (!%p1819_p4), %s1471_s20, 4294967168  ;;  %s2792_s28 = sadd.s32 4294967294, %s2789_s19  }
 0xb8a   : > { %s1479_s6 = sand.u32 1, %s2792_s28  }
 0xb8b   : > { %s1480_s21 = scalar_lea.sflag [#allocation12], %s1479_s6 }
 0xb8c   : > { %2149 = dma.done.wait (!%p1819_p4), %s1480_s21, 1024  }
 0xb8d   : > { %2151 = vsyncadd (!%p1819_p4), %s1480_s21, 4294966272  ;;  %s31_s29 = sadd.s32 1, %s2789_s19   ;;  %s2793_s18 = sld [smem:[#allocation23_spill]] }
 0xb8e   : > { %p28_p10 = scmp.ge.s32.totalorder %s31_s29, 4   ;;  %s2794_s27 = sld [smem:[#allocation20_spill]] }
 0xb8f   : > { %s2795_s28 = sld [smem:[#allocation22_spill]]  ;;  %s2796_s24 = smov %s2158_s25 }
 0xb90   : > { %s2797_s25 = smov %s2162_s26  ;;  %30 = sbr.rel (!%p28_p10) target bundleno = 17 (0x11), region = 145 }
 0xb93   : > { %s2798_s26 = smov %s2793_s18 }
 0xb97   :  { %1494 = vsyncpa [#allocation3], 1 }
 0xb98   :  { %1496 = vsyncpa [#allocation3 + $0x1], 1 }
 0xb99   :  { %1497 = vsyncpa [#allocation6], 1 }
 0xb9a   :  { %1499 = vsyncpa [#allocation6 + $0x1], 1 }
 0xb9b   :  { %1500 = vsyncpa [#allocation9], 1 }
 0xb9c   :  { %1501 = vsyncpa [#allocation4], 1 }
 0xb9d   :  { %1503 = vsyncpa [#allocation4 + $0x1], 1 }
 0xb9e   :  { %1504 = vsyncpa [#allocation12], 1 }
 0xb9f   :  { %1506 = vsyncpa [#allocation12 + $0x1], 1 }

</bundles_post_ra>
